<compile_context>
chip_gen: v7x
topology: tpu7x:2x2x1
jax: 0.10.0
libtpu: 0.0.40
codegen_flags: <defaults>
</compile_context>

<pallas_src>
import functools

import jax
import jax.numpy as jnp
from jax.experimental import pallas as pl
from jax.experimental.pallas import tpu as pltpu

MATMUL_DTYPE = jnp.bfloat16   # jnp.float32 for exact-f32 matmul numerics
LEAKY_SLOPE = 0.01            # PyTorch LeakyReLU default
BN_EPS = 1e-4                 # module constructs BatchNorm1d(eps=0.0001)


def make_fused_gin_kernel(num_layers, latent_dim, num_graphs):
    """Builds the fused all-layers GIN kernel for static layer/graph counts."""

    def kernel(*refs):
        adj_ref, x_ref, batch_ref = refs[0], refs[1], refs[2]
        p_refs = refs[3:3 + 4 * num_layers]
        xcat_ref = refs[3 + 4 * num_layers]
        pool_ref = refs[3 + 4 * num_layers + 1]

        adj = adj_ref[...]                         # bf16 [N, N], resident all layers
        x = x_ref[...]                             # f32  [N, F]
        n = x.shape[0]
        inv_n = jnp.float32(1.0 / n)

        # One-hot segment matrix [G, N] for MXU pooling (built once, f32 so the
        # per-layer pooled sums are effectively exact).
        batch_row = batch_ref[...]                 # int32 [1, N]
        graph_ids = jax.lax.broadcasted_iota(jnp.int32, (num_graphs, n), 0)
        seg = (graph_ids == batch_row).astype(jnp.float32)   # [G, N]

        for l in range(num_layers):                # unrolled: L is small & static
            w1 = p_refs[4 * l + 0][...]            # bf16 [d_in, D]
            b1 = p_refs[4 * l + 1][...]            # f32  [1, D]
            w2 = p_refs[4 * l + 2][...]            # bf16 [D, D]
            b2 = p_refs[4 * l + 3][...]            # f32  [1, D]

            # GraphConv: h = adj @ x  (MXU, f32 accumulate)
            h = jnp.dot(adj, x.astype(MATMUL_DTYPE),
                        preferred_element_type=jnp.float32)
            # MLP: Linear -> LeakyReLU -> Linear
            h1 = jnp.dot(h.astype(MATMUL_DTYPE), w1,
                         preferred_element_type=jnp.float32) + b1
            h1 = jnp.where(h1 > 0, h1, jnp.float32(LEAKY_SLOPE) * h1)
            h2 = jnp.dot(h1.astype(MATMUL_DTYPE), w2,
                         preferred_element_type=jnp.float32) + b2

            # BatchNorm1d (affine=False, training-mode batch stats, biased var)
            # -- single pass over h2: sum and sum-of-squares together, f32.
            s1 = jnp.sum(h2, axis=0, keepdims=True)
            s2 = jnp.sum(h2 * h2, axis=0, keepdims=True)
            mean = s1 * inv_n
            var = jnp.maximum(s2 * inv_n - mean * mean, 0.0)
            xbn = (h2 - mean) * jax.lax.rsqrt(var + jnp.float32(BN_EPS))

            # Write this layer's node features and pooled sums immediately:
            # no outs-list/concat keeping L activations live, and the pooled
            # output is one MXU matmul instead of G masked reductions.
            lo = l * latent_dim
            hi = lo + latent_dim
            xcat_ref[:, lo:hi] = xbn
            pool_ref[:, lo:hi] = jnp.dot(seg, xbn,
                                         preferred_element_type=jnp.float32)

            x = xbn                                # next layer's input, stays on-chip

    return kernel


def xavier_uniform(key, fan_in, fan_out):
    bound = jnp.sqrt(6.0 / (fan_in + fan_out))
    return jax.random.uniform(key, (fan_in, fan_out), jnp.float32, -bound, bound)


def init_params(key, num_features, latent_dim, num_gc_layers):
    """Deterministic parameter init mirroring backbone_GIN.__init__ shapes."""
    params = []
    for i in range(num_gc_layers):
        in_dim = num_features if i == 0 else latent_dim
        key, k1, k2, k3, k4 = jax.random.split(key, 5)
        w1 = xavier_uniform(k1, in_dim, latent_dim)       # Linear(in, latent).weight.T
        w2 = xavier_uniform(k2, latent_dim, latent_dim)   # Linear(latent, latent).weight.T
        # PyTorch default bias init: U(-1/sqrt(fan_in), 1/sqrt(fan_in))
        b1 = jax.random.uniform(k3, (1, latent_dim), jnp.float32,
                                -1.0 / jnp.sqrt(in_dim), 1.0 / jnp.sqrt(in_dim))
        b2 = jax.random.uniform(k4, (1, latent_dim), jnp.float32,
                                -1.0 / jnp.sqrt(latent_dim), 1.0 / jnp.sqrt(latent_dim))
        params.append((w1, b1, w2, b2))
    return params


@functools.partial(jax.jit, static_argnames=("num_graphs",))
def backbone_gin_forward(x, adj, batch, params, num_graphs):
    """Returns (g_enc [G, latent*L], l_enc [N, latent*L])."""
    n = adj.shape[0]
    # PyTorch fallback: x is None / 1-D / zero-width features -> ones [N, 1]
    if x is None or x.ndim == 1 or x.shape[1] == 0:
        x = jnp.ones((n, 1), jnp.float32)
    x = x.astype(jnp.float32)

    num_layers = len(params)
    latent = params[0][0].shape[1]
    ld = num_layers * latent

    adj_mx = adj.astype(MATMUL_DTYPE)            # lossless for {0,1,2} adjacency
    batch_row = batch.reshape(1, n).astype(jnp.int32)

    flat_params = []
    for (w1, b1, w2, b2) in params:
        flat_params += [w1.astype(MATMUL_DTYPE), b1.astype(jnp.float32),
                        w2.astype(MATMUL_DTYPE), b2.astype(jnp.float32)]

    # Advisory cost estimate for XLA's scheduler (includes pooling matmuls).
    flops = 0
    for (w1, _, w2, _) in params:
        d_in, d_out = w1.shape
        flops += (2 * n * n * d_in            # adj @ x
                  + 2 * n * d_in * d_out      # Linear 1
                  + 2 * n * d_out * d_out     # Linear 2
                  + 2 * num_graphs * n * d_out)  # seg @ xbn pooling
    param_bytes = sum(int(p.size) * int(p.dtype.itemsize) for p in flat_params)
    out_bytes = (n + num_graphs) * ld * 4
    bytes_accessed = (adj_mx.size * 2 + x.size * 4 + batch_row.size * 4
                      + param_bytes + out_bytes)
    cost = pl.CostEstimate(flops=int(flops),
                           transcendentals=int(num_layers * latent),
                           bytes_accessed=int(bytes_accessed))

    # Scoped-VMEM limit: resident adj + x + params + outputs + live
    # activations, with 2x headroom (default 16/32 MiB caps N far below
    # what physical VMEM allows).
    live_act_bytes = 8 * n * latent * 4
    vmem_est = (adj_mx.size * 2 + x.size * 4 + param_bytes + out_bytes
                + live_act_bytes + batch_row.size * 4)
    vmem_limit = int(min(100 * 1024 * 1024, max(32 * 1024 * 1024, 2 * vmem_est)))

    kernel = make_fused_gin_kernel(num_layers, latent, num_graphs)
    num_inputs = 3 + len(flat_params)
    vmem_spec = pl.BlockSpec(memory_space=pltpu.MemorySpace.VMEM)

    xcat, pooled = pl.pallas_call(
        kernel,
        out_shape=(jax.ShapeDtypeStruct((n, ld), jnp.float32),
                   jax.ShapeDtypeStruct((num_graphs, ld), jnp.float32)),
        in_specs=[vmem_spec] * num_inputs,
        out_specs=(vmem_spec, vmem_spec),
        compiler_params=pltpu.CompilerParams(vmem_limit_bytes=vmem_limit),
        cost_estimate=cost,
    )(adj_mx, x, batch_row, *flat_params)

    return pooled, xcat


def reference_forward(x, adj, batch, params, num_graphs):
    """Plain-JAX reference with identical casting (validates kernel mechanics)."""
    if x is None or x.ndim == 1 or x.shape[1] == 0:
        x = jnp.ones((adj.shape[0], 1), jnp.float32)
    x = x.astype(jnp.float32)
    adj_mx = adj.astype(MATMUL_DTYPE)
    xs, pooled = [], []
    seg = (batch[None, :] == jnp.arange(num_graphs, dtype=batch.dtype)[:, None]
           ).astype(jnp.float32)
    for (w1, b1, w2, b2) in params:
        h = jnp.dot(adj_mx, x.astype(MATMUL_DTYPE), preferred_element_type=jnp.float32)
        h1 = jnp.dot(h.astype(MATMUL_DTYPE), w1.astype(MATMUL_DTYPE),
                     preferred_element_type=jnp.float32) + b1
        h1 = jnp.where(h1 > 0, h1, LEAKY_SLOPE * h1)
        h2 = jnp.dot(h1.astype(MATMUL_DTYPE), w2.astype(MATMUL_DTYPE),
                     preferred_element_type=jnp.float32) + b2
        mean = jnp.mean(h2, axis=0, keepdims=True)
        var = jnp.mean(jnp.square(h2 - mean), axis=0, keepdims=True)
        x = (h2 - mean) * jax.lax.rsqrt(var + BN_EPS)
        xs.append(x)
        pooled.append(seg @ x)
    return jnp.concatenate(pooled, axis=1), jnp.concatenate(xs, axis=1)


if __name__ == "__main__":
    # Small shapes consistent with the module's forward:
    #   N=16 nodes, num_features=4, latent_dim=32, num_gc_layers=3, 2 graphs.
    N, F, D, L, G = 16, 4, 32, 3, 2

    key = jax.random.PRNGKey(0)
    key, kx, ka = jax.random.split(key, 3)

    x = jax.random.normal(kx, (N, F), jnp.float32)
    adj = (jax.random.uniform(ka, (N, N), jnp.float32) > 0.5).astype(jnp.float32)
    adj = adj + jnp.eye(N, dtype=jnp.float32)  # self loops (typical GIN input data)
    batch = jnp.concatenate([jnp.zeros(N // 2, jnp.int32),
                             jnp.ones(N - N // 2, jnp.int32)])

    params = init_params(key, F, D, L)

    g_enc, l_enc = backbone_gin_forward(x, adj, batch, params, num_graphs=G)
    jax.block_until_ready((g_enc, l_enc))

    assert g_enc.shape == (G, D * L), g_enc.shape
    assert l_enc.shape == (N, D * L), l_enc.shape

    g_ref, l_ref = reference_forward(x, adj, batch, params, G)
    err_g = float(jnp.max(jnp.abs(g_enc - g_ref)))
    err_l = float(jnp.max(jnp.abs(l_enc - l_ref)))
    assert err_g < 2e-3 and err_l < 2e-3, (err_g, err_l)

    print("KERNEL_OK")
</pallas_src>

<mosaic_0001>
module attributes {stable_mosaic.version = 11 : i64} {
  func.func @kernel(%arg0: memref<16x16xbf16, #tpu.memory_space<vmem>>, %arg1: memref<16x4xf32, #tpu.memory_space<vmem>>, %arg2: memref<1x16xi32, #tpu.memory_space<vmem>>, %arg3: memref<4x32xbf16, #tpu.memory_space<vmem>>, %arg4: memref<1x32xf32, #tpu.memory_space<vmem>>, %arg5: memref<32x32xbf16, #tpu.memory_space<vmem>>, %arg6: memref<1x32xf32, #tpu.memory_space<vmem>>, %arg7: memref<32x32xbf16, #tpu.memory_space<vmem>>, %arg8: memref<1x32xf32, #tpu.memory_space<vmem>>, %arg9: memref<32x32xbf16, #tpu.memory_space<vmem>>, %arg10: memref<1x32xf32, #tpu.memory_space<vmem>>, %arg11: memref<32x32xbf16, #tpu.memory_space<vmem>>, %arg12: memref<1x32xf32, #tpu.memory_space<vmem>>, %arg13: memref<32x32xbf16, #tpu.memory_space<vmem>>, %arg14: memref<1x32xf32, #tpu.memory_space<vmem>>, %arg15: memref<16x96xf32, #tpu.memory_space<vmem>>, %arg16: memref<2x96xf32, #tpu.memory_space<vmem>>) attributes {dimension_semantics = [], scalar_prefetch = 0 : i64, scratch_operands = 0 : i64, tpu.core_type = #tpu.core_type<tc>} {
    %c0 = arith.constant 0 : index
    %c0_0 = arith.constant 0 : index
    %0 = vector.load %arg0[%c0, %c0_0] : memref<16x16xbf16, #tpu.memory_space<vmem>>, vector<16x16xbf16>
    %c0_1 = arith.constant 0 : index
    %c0_2 = arith.constant 0 : index
    %1 = vector.load %arg1[%c0_1, %c0_2] : memref<16x4xf32, #tpu.memory_space<vmem>>, vector<16x4xf32>
    %c0_3 = arith.constant 0 : index
    %c0_4 = arith.constant 0 : index
    %2 = vector.load %arg2[%c0_3, %c0_4] : memref<1x16xi32, #tpu.memory_space<vmem>>, vector<1x16xi32>
    %3 = tpu.iota {dimensions = array<i32: 0>} : vector<2x16xi32>
    %4 = vector.broadcast %2 : vector<1x16xi32> to vector<2x16xi32>
    %5 = arith.cmpi eq, %3, %4 : vector<2x16xi32>
    %6 = arith.extui %5 : vector<2x16xi1> to vector<2x16xi32>
    %7 = arith.sitofp %6 : vector<2x16xi32> to vector<2x16xf32>
    %c0_5 = arith.constant 0 : index
    %c0_6 = arith.constant 0 : index
    %8 = vector.load %arg3[%c0_5, %c0_6] : memref<4x32xbf16, #tpu.memory_space<vmem>>, vector<4x32xbf16>
    %c0_7 = arith.constant 0 : index
    %c0_8 = arith.constant 0 : index
    %9 = vector.load %arg4[%c0_7, %c0_8] : memref<1x32xf32, #tpu.memory_space<vmem>>, vector<1x32xf32>
    %c0_9 = arith.constant 0 : index
    %c0_10 = arith.constant 0 : index
    %10 = vector.load %arg5[%c0_9, %c0_10] : memref<32x32xbf16, #tpu.memory_space<vmem>>, vector<32x32xbf16>
    %c0_11 = arith.constant 0 : index
    %c0_12 = arith.constant 0 : index
    %11 = vector.load %arg6[%c0_11, %c0_12] : memref<1x32xf32, #tpu.memory_space<vmem>>, vector<1x32xf32>
    %12 = arith.truncf %1 : vector<16x4xf32> to vector<16x4xbf16>
    %cst = arith.constant dense<0.000000e+00> : vector<16x4xf32>
    %13 = tpu.matmul %0, %12, %cst {dimension_numbers = #tpu.dot_dimension_numbers<[1], [0], [0], [1], [0, 0, 1, 1], [], []>} : vector<16x16xbf16>, vector<16x4xbf16>, vector<16x4xf32> -> vector<16x4xf32>
    %14 = arith.truncf %13 : vector<16x4xf32> to vector<16x4xbf16>
    %cst_13 = arith.constant dense<0.000000e+00> : vector<16x32xf32>
    %15 = tpu.matmul %14, %8, %cst_13 {dimension_numbers = #tpu.dot_dimension_numbers<[1], [0], [0], [1], [0, 0, 1, 1], [], []>} : vector<16x4xbf16>, vector<4x32xbf16>, vector<16x32xf32> -> vector<16x32xf32>
    %16 = vector.broadcast %9 : vector<1x32xf32> to vector<16x32xf32>
    %17 = arith.addf %15, %16 : vector<16x32xf32>
    %cst_14 = arith.constant 0.000000e+00 : f32
    %18 = vector.broadcast %cst_14 : f32 to vector<16x32xf32>
    %19 = arith.cmpf ogt, %17, %18 : vector<16x32xf32>
    %cst_15 = arith.constant 0.00999999977 : f32
    %20 = vector.broadcast %cst_15 : f32 to vector<16x32xf32>
    %21 = arith.mulf %20, %17 : vector<16x32xf32>
    %22 = arith.select %19, %17, %21 : vector<16x32xi1>, vector<16x32xf32>
    %23 = arith.truncf %22 : vector<16x32xf32> to vector<16x32xbf16>
    %cst_16 = arith.constant dense<0.000000e+00> : vector<16x32xf32>
    %24 = tpu.matmul %23, %10, %cst_16 {dimension_numbers = #tpu.dot_dimension_numbers<[1], [0], [0], [1], [0, 0, 1, 1], [], []>} : vector<16x32xbf16>, vector<32x32xbf16>, vector<16x32xf32> -> vector<16x32xf32>
    %25 = vector.broadcast %11 : vector<1x32xf32> to vector<16x32xf32>
    %26 = arith.addf %24, %25 : vector<16x32xf32>
    %cst_17 = arith.constant dense<0.000000e+00> : vector<32xf32>
    %27 = vector.multi_reduction <add>, %26, %cst_17 [0] : vector<16x32xf32> to vector<32xf32>
    %28 = vector.shape_cast %27 : vector<32xf32> to vector<1x32xf32>
    %29 = arith.mulf %26, %26 : vector<16x32xf32>
    %cst_18 = arith.constant dense<0.000000e+00> : vector<32xf32>
    %30 = vector.multi_reduction <add>, %29, %cst_18 [0] : vector<16x32xf32> to vector<32xf32>
    %31 = vector.shape_cast %30 : vector<32xf32> to vector<1x32xf32>
    %cst_19 = arith.constant 6.250000e-02 : f32
    %32 = vector.broadcast %cst_19 : f32 to vector<1x32xf32>
    %33 = arith.mulf %28, %32 : vector<1x32xf32>
    %cst_20 = arith.constant 6.250000e-02 : f32
    %34 = vector.broadcast %cst_20 : f32 to vector<1x32xf32>
    %35 = arith.mulf %31, %34 : vector<1x32xf32>
    %36 = arith.mulf %33, %33 : vector<1x32xf32>
    %37 = arith.subf %35, %36 : vector<1x32xf32>
    %cst_21 = arith.constant 0.000000e+00 : f32
    %38 = vector.broadcast %cst_21 : f32 to vector<1x32xf32>
    %39 = arith.maximumf %37, %38 : vector<1x32xf32>
    %40 = vector.broadcast %33 : vector<1x32xf32> to vector<16x32xf32>
    %41 = arith.subf %26, %40 : vector<16x32xf32>
    %cst_22 = arith.constant 9.99999974E-5 : f32
    %42 = vector.broadcast %cst_22 : f32 to vector<1x32xf32>
    %43 = arith.addf %39, %42 : vector<1x32xf32>
    %44 = math.rsqrt %43 : vector<1x32xf32>
    %45 = vector.broadcast %44 : vector<1x32xf32> to vector<16x32xf32>
    %46 = arith.mulf %41, %45 : vector<16x32xf32>
    %c0_23 = arith.constant 0 : index
    %c0_24 = arith.constant 0 : index
    %47 = vector.load %arg15[%c0_23, %c0_24] : memref<16x96xf32, #tpu.memory_space<vmem>>, vector<16x32xf32>
    tpu.vector_store %arg15[%c0_23, %c0_24], %46 {strides = array<i32>} : memref<16x96xf32, #tpu.memory_space<vmem>>, vector<16x32xf32>,
    %cst_25 = arith.constant dense<0.000000e+00> : vector<2x32xf32>
    %48 = tpu.matmul %7, %46, %cst_25 {dimension_numbers = #tpu.dot_dimension_numbers<[1], [0], [0], [1], [0, 0, 1, 1], [], []>} : vector<2x16xf32>, vector<16x32xf32>, vector<2x32xf32> -> vector<2x32xf32>
    %c0_26 = arith.constant 0 : index
    %c0_27 = arith.constant 0 : index
    %49 = vector.load %arg16[%c0_26, %c0_27] : memref<2x96xf32, #tpu.memory_space<vmem>>, vector<2x32xf32>
    tpu.vector_store %arg16[%c0_26, %c0_27], %48 {strides = array<i32>} : memref<2x96xf32, #tpu.memory_space<vmem>>, vector<2x32xf32>,
    %c0_28 = arith.constant 0 : index
    %c0_29 = arith.constant 0 : index
    %50 = vector.load %arg7[%c0_28, %c0_29] : memref<32x32xbf16, #tpu.memory_space<vmem>>, vector<32x32xbf16>
    %c0_30 = arith.constant 0 : index
    %c0_31 = arith.constant 0 : index
    %51 = vector.load %arg8[%c0_30, %c0_31] : memref<1x32xf32, #tpu.memory_space<vmem>>, vector<1x32xf32>
    %c0_32 = arith.constant 0 : index
    %c0_33 = arith.constant 0 : index
    %52 = vector.load %arg9[%c0_32, %c0_33] : memref<32x32xbf16, #tpu.memory_space<vmem>>, vector<32x32xbf16>
    %c0_34 = arith.constant 0 : index
    %c0_35 = arith.constant 0 : index
    %53 = vector.load %arg10[%c0_34, %c0_35] : memref<1x32xf32, #tpu.memory_space<vmem>>, vector<1x32xf32>
    %54 = arith.truncf %46 : vector<16x32xf32> to vector<16x32xbf16>
    %cst_36 = arith.constant dense<0.000000e+00> : vector<16x32xf32>
    %55 = tpu.matmul %0, %54, %cst_36 {dimension_numbers = #tpu.dot_dimension_numbers<[1], [0], [0], [1], [0, 0, 1, 1], [], []>} : vector<16x16xbf16>, vector<16x32xbf16>, vector<16x32xf32> -> vector<16x32xf32>
    %56 = arith.truncf %55 : vector<16x32xf32> to vector<16x32xbf16>
    %cst_37 = arith.constant dense<0.000000e+00> : vector<16x32xf32>
    %57 = tpu.matmul %56, %50, %cst_37 {dimension_numbers = #tpu.dot_dimension_numbers<[1], [0], [0], [1], [0, 0, 1, 1], [], []>} : vector<16x32xbf16>, vector<32x32xbf16>, vector<16x32xf32> -> vector<16x32xf32>
    %58 = vector.broadcast %51 : vector<1x32xf32> to vector<16x32xf32>
    %59 = arith.addf %57, %58 : vector<16x32xf32>
    %cst_38 = arith.constant 0.000000e+00 : f32
    %60 = vector.broadcast %cst_38 : f32 to vector<16x32xf32>
    %61 = arith.cmpf ogt, %59, %60 : vector<16x32xf32>
    %cst_39 = arith.constant 0.00999999977 : f32
    %62 = vector.broadcast %cst_39 : f32 to vector<16x32xf32>
    %63 = arith.mulf %62, %59 : vector<16x32xf32>
    %64 = arith.select %61, %59, %63 : vector<16x32xi1>, vector<16x32xf32>
    %65 = arith.truncf %64 : vector<16x32xf32> to vector<16x32xbf16>
    %cst_40 = arith.constant dense<0.000000e+00> : vector<16x32xf32>
    %66 = tpu.matmul %65, %52, %cst_40 {dimension_numbers = #tpu.dot_dimension_numbers<[1], [0], [0], [1], [0, 0, 1, 1], [], []>} : vector<16x32xbf16>, vector<32x32xbf16>, vector<16x32xf32> -> vector<16x32xf32>
    %67 = vector.broadcast %53 : vector<1x32xf32> to vector<16x32xf32>
    %68 = arith.addf %66, %67 : vector<16x32xf32>
    %cst_41 = arith.constant dense<0.000000e+00> : vector<32xf32>
    %69 = vector.multi_reduction <add>, %68, %cst_41 [0] : vector<16x32xf32> to vector<32xf32>
    %70 = vector.shape_cast %69 : vector<32xf32> to vector<1x32xf32>
    %71 = arith.mulf %68, %68 : vector<16x32xf32>
    %cst_42 = arith.constant dense<0.000000e+00> : vector<32xf32>
    %72 = vector.multi_reduction <add>, %71, %cst_42 [0] : vector<16x32xf32> to vector<32xf32>
    %73 = vector.shape_cast %72 : vector<32xf32> to vector<1x32xf32>
    %cst_43 = arith.constant 6.250000e-02 : f32
    %74 = vector.broadcast %cst_43 : f32 to vector<1x32xf32>
    %75 = arith.mulf %70, %74 : vector<1x32xf32>
    %cst_44 = arith.constant 6.250000e-02 : f32
    %76 = vector.broadcast %cst_44 : f32 to vector<1x32xf32>
    %77 = arith.mulf %73, %76 : vector<1x32xf32>
    %78 = arith.mulf %75, %75 : vector<1x32xf32>
    %79 = arith.subf %77, %78 : vector<1x32xf32>
    %cst_45 = arith.constant 0.000000e+00 : f32
    %80 = vector.broadcast %cst_45 : f32 to vector<1x32xf32>
    %81 = arith.maximumf %79, %80 : vector<1x32xf32>
    %82 = vector.broadcast %75 : vector<1x32xf32> to vector<16x32xf32>
    %83 = arith.subf %68, %82 : vector<16x32xf32>
    %cst_46 = arith.constant 9.99999974E-5 : f32
    %84 = vector.broadcast %cst_46 : f32 to vector<1x32xf32>
    %85 = arith.addf %81, %84 : vector<1x32xf32>
    %86 = math.rsqrt %85 : vector<1x32xf32>
    %87 = vector.broadcast %86 : vector<1x32xf32> to vector<16x32xf32>
    %88 = arith.mulf %83, %87 : vector<16x32xf32>
    %c0_47 = arith.constant 0 : index
    %c32 = arith.constant 32 : index
    %89 = vector.load %arg15[%c0_47, %c32] : memref<16x96xf32, #tpu.memory_space<vmem>>, vector<16x32xf32>
    tpu.vector_store %arg15[%c0_47, %c32], %88 {strides = array<i32>} : memref<16x96xf32, #tpu.memory_space<vmem>>, vector<16x32xf32>,
    %cst_48 = arith.constant dense<0.000000e+00> : vector<2x32xf32>
    %90 = tpu.matmul %7, %88, %cst_48 {dimension_numbers = #tpu.dot_dimension_numbers<[1], [0], [0], [1], [0, 0, 1, 1], [], []>} : vector<2x16xf32>, vector<16x32xf32>, vector<2x32xf32> -> vector<2x32xf32>
    %c0_49 = arith.constant 0 : index
    %c32_50 = arith.constant 32 : index
    %91 = vector.load %arg16[%c0_49, %c32_50] : memref<2x96xf32, #tpu.memory_space<vmem>>, vector<2x32xf32>
    tpu.vector_store %arg16[%c0_49, %c32_50], %90 {strides = array<i32>} : memref<2x96xf32, #tpu.memory_space<vmem>>, vector<2x32xf32>,
    %c0_51 = arith.constant 0 : index
    %c0_52 = arith.constant 0 : index
    %92 = vector.load %arg11[%c0_51, %c0_52] : memref<32x32xbf16, #tpu.memory_space<vmem>>, vector<32x32xbf16>
    %c0_53 = arith.constant 0 : index
    %c0_54 = arith.constant 0 : index
    %93 = vector.load %arg12[%c0_53, %c0_54] : memref<1x32xf32, #tpu.memory_space<vmem>>, vector<1x32xf32>
    %c0_55 = arith.constant 0 : index
    %c0_56 = arith.constant 0 : index
    %94 = vector.load %arg13[%c0_55, %c0_56] : memref<32x32xbf16, #tpu.memory_space<vmem>>, vector<32x32xbf16>
    %c0_57 = arith.constant 0 : index
    %c0_58 = arith.constant 0 : index
    %95 = vector.load %arg14[%c0_57, %c0_58] : memref<1x32xf32, #tpu.memory_space<vmem>>, vector<1x32xf32>
    %96 = arith.truncf %88 : vector<16x32xf32> to vector<16x32xbf16>
    %cst_59 = arith.constant dense<0.000000e+00> : vector<16x32xf32>
    %97 = tpu.matmul %0, %96, %cst_59 {dimension_numbers = #tpu.dot_dimension_numbers<[1], [0], [0], [1], [0, 0, 1, 1], [], []>} : vector<16x16xbf16>, vector<16x32xbf16>, vector<16x32xf32> -> vector<16x32xf32>
    %98 = arith.truncf %97 : vector<16x32xf32> to vector<16x32xbf16>
    %cst_60 = arith.constant dense<0.000000e+00> : vector<16x32xf32>
    %99 = tpu.matmul %98, %92, %cst_60 {dimension_numbers = #tpu.dot_dimension_numbers<[1], [0], [0], [1], [0, 0, 1, 1], [], []>} : vector<16x32xbf16>, vector<32x32xbf16>, vector<16x32xf32> -> vector<16x32xf32>
    %100 = vector.broadcast %93 : vector<1x32xf32> to vector<16x32xf32>
    %101 = arith.addf %99, %100 : vector<16x32xf32>
    %cst_61 = arith.constant 0.000000e+00 : f32
    %102 = vector.broadcast %cst_61 : f32 to vector<16x32xf32>
    %103 = arith.cmpf ogt, %101, %102 : vector<16x32xf32>
    %cst_62 = arith.constant 0.00999999977 : f32
    %104 = vector.broadcast %cst_62 : f32 to vector<16x32xf32>
    %105 = arith.mulf %104, %101 : vector<16x32xf32>
    %106 = arith.select %103, %101, %105 : vector<16x32xi1>, vector<16x32xf32>
    %107 = arith.truncf %106 : vector<16x32xf32> to vector<16x32xbf16>
    %cst_63 = arith.constant dense<0.000000e+00> : vector<16x32xf32>
    %108 = tpu.matmul %107, %94, %cst_63 {dimension_numbers = #tpu.dot_dimension_numbers<[1], [0], [0], [1], [0, 0, 1, 1], [], []>} : vector<16x32xbf16>, vector<32x32xbf16>, vector<16x32xf32> -> vector<16x32xf32>
    %109 = vector.broadcast %95 : vector<1x32xf32> to vector<16x32xf32>
    %110 = arith.addf %108, %109 : vector<16x32xf32>
    %cst_64 = arith.constant dense<0.000000e+00> : vector<32xf32>
    %111 = vector.multi_reduction <add>, %110, %cst_64 [0] : vector<16x32xf32> to vector<32xf32>
    %112 = vector.shape_cast %111 : vector<32xf32> to vector<1x32xf32>
    %113 = arith.mulf %110, %110 : vector<16x32xf32>
    %cst_65 = arith.constant dense<0.000000e+00> : vector<32xf32>
    %114 = vector.multi_reduction <add>, %113, %cst_65 [0] : vector<16x32xf32> to vector<32xf32>
    %115 = vector.shape_cast %114 : vector<32xf32> to vector<1x32xf32>
    %cst_66 = arith.constant 6.250000e-02 : f32
    %116 = vector.broadcast %cst_66 : f32 to vector<1x32xf32>
    %117 = arith.mulf %112, %116 : vector<1x32xf32>
    %cst_67 = arith.constant 6.250000e-02 : f32
    %118 = vector.broadcast %cst_67 : f32 to vector<1x32xf32>
    %119 = arith.mulf %115, %118 : vector<1x32xf32>
    %120 = arith.mulf %117, %117 : vector<1x32xf32>
    %121 = arith.subf %119, %120 : vector<1x32xf32>
    %cst_68 = arith.constant 0.000000e+00 : f32
    %122 = vector.broadcast %cst_68 : f32 to vector<1x32xf32>
    %123 = arith.maximumf %121, %122 : vector<1x32xf32>
    %124 = vector.broadcast %117 : vector<1x32xf32> to vector<16x32xf32>
    %125 = arith.subf %110, %124 : vector<16x32xf32>
    %cst_69 = arith.constant 9.99999974E-5 : f32
    %126 = vector.broadcast %cst_69 : f32 to vector<1x32xf32>
    %127 = arith.addf %123, %126 : vector<1x32xf32>
    %128 = math.rsqrt %127 : vector<1x32xf32>
    %129 = vector.broadcast %128 : vector<1x32xf32> to vector<16x32xf32>
    %130 = arith.mulf %125, %129 : vector<16x32xf32>
    %c0_70 = arith.constant 0 : index
    %c64 = arith.constant 64 : index
    %131 = vector.load %arg15[%c0_70, %c64] : memref<16x96xf32, #tpu.memory_space<vmem>>, vector<16x32xf32>
    tpu.vector_store %arg15[%c0_70, %c64], %130 {strides = array<i32>} : memref<16x96xf32, #tpu.memory_space<vmem>>, vector<16x32xf32>,
    %cst_71 = arith.constant dense<0.000000e+00> : vector<2x32xf32>
    %132 = tpu.matmul %7, %130, %cst_71 {dimension_numbers = #tpu.dot_dimension_numbers<[1], [0], [0], [1], [0, 0, 1, 1], [], []>} : vector<2x16xf32>, vector<16x32xf32>, vector<2x32xf32> -> vector<2x32xf32>
    %c0_72 = arith.constant 0 : index
    %c64_73 = arith.constant 64 : index
    %133 = vector.load %arg16[%c0_72, %c64_73] : memref<2x96xf32, #tpu.memory_space<vmem>>, vector<2x32xf32>
    tpu.vector_store %arg16[%c0_72, %c64_73], %132 {strides = array<i32>} : memref<2x96xf32, #tpu.memory_space<vmem>>, vector<2x32xf32>,
    return
  }
}

</mosaic_0001>

<bundles_post_ra>
// kernel: backbone_gin_forward.1
= control target key start
LH: loop header
LB: loop body
LE: loop exit
PB: predicated region body
PF: predicated region fallthrough
CT: control target
= control target key end

     0   :  { %s1487_s0 = inlined_call_operand.vmem [shape: bf16[16,16], index: 0, kind: input, shape index: {}]   ;;  %s1488_s1 = inlined_call_operand.vmem [shape: f32[16,4], index: 1, kind: input, shape index: {}]   ;;  %s1489_s2 = inlined_call_operand.vmem [shape: s32[1,16], index: 2, kind: input, shape index: {}]   ;;  %s1490_s3 = inlined_call_operand.vmem [shape: bf16[4,32], index: 3, kind: input, shape index: {}]   ;;  %s1491_s4 = inlined_call_operand.vmem [shape: f32[1,32], index: 4, kind: input, shape index: {}]   ;;  %s1492_s5 = inlined_call_operand.vmem [shape: bf16[32,32], index: 5, kind: input, shape index: {}]   ;;  %s1493_s6 = inlined_call_operand.vmem [shape: f32[1,32], index: 6, kind: input, shape index: {}]   ;;  %s1494_s7 = inlined_call_operand.vmem [shape: bf16[32,32], index: 7, kind: input, shape index: {}]   ;;  %s1495_s8 = inlined_call_operand.vmem [shape: f32[1,32], index: 8, kind: input, shape index: {}]   ;;  %s1496_s9 = inlined_call_operand.vmem [shape: bf16[32,32], index: 9, kind: input, shape index: {}]   ;;  %s1497_s10 = inlined_call_operand.vmem [shape: f32[1,32], index: 10, kind: input, shape index: {}]   ;;  %s1498_s11 = inlined_call_operand.vmem [shape: bf16[32,32], index: 11, kind: input, shape index: {}]   ;;  %s1499_s12 = inlined_call_operand.vmem [shape: f32[1,32], index: 12, kind: input, shape index: {}]   ;;  %s1500_s13 = inlined_call_operand.vmem [shape: bf16[32,32], index: 13, kind: input, shape index: {}]   ;;  %s1501_s14 = inlined_call_operand.vmem [shape: f32[1,32], index: 14, kind: input, shape index: {}]   ;;  %s1502_s15 = inlined_call_operand.hbm [shape: f32[16,96], index: 15, kind: output, shape index: {0}]   ;;  %s1503_s16 = inlined_call_operand.hbm [shape: f32[2,96], index: 16, kind: output, shape index: {1}]  }
   0x1   :  { %1504 = sst [smem:[#allocation8_spill]] %s1487_s0 }
   0x2   :  { %22 = vsyncpa [#allocation3], 0  ;;  %v57_v0 = vld [vmem:[%s1488_s1] sm:$0xff]  ;;  %v58_v1 = vld [vmem:[%s1488_s1 + $0x8] sm:$0xff]  ;;  %v1226_v2 = vmov 0.0   ;;  %vm1227_vm0 = vmmov 0  }
   0x3   :  { %1058 = vmatprep.subr.bf16.mxu0 %v1226_v2  ;;  %v76_v3 = vpack.c.bf16 %v58_v1, %v57_v0  ;;  %1060 = vmatprep.mubr.msk.bf16.mxu0 %vm1227_vm0, %v1226_v2  ;;  %s1505_s27 = sld [smem:[#allocation8_spill]]  ;;  %vm82_vm1 = vcmask 130048  }
   0x4   :  { %1064 = vmatprep.subr.bf16.mxu1 %v1226_v2  ;;  %1066 = vmatprep.mubr.msk.bf16.mxu1 %vm1227_vm0, %v1226_v2 }
   0x5   :  { %1059 = vmatpush3.bf16.msra.mxu0 %v76_v3 }
   0x6   :  { %1070 = vmatprep.subr.bf16.mxu0 %v1226_v2 }
   0x9   :  { %v1332_v4 = vld [vmem:[%s1505_s27] sm:$0xff]  }
   0xa   :  { %1061 = vmatmul.mubr.msk.bf16.vlgmr.msra.gmra.mrb[0].mxu0 %vm82_vm1, %v1332_v4 }
   0xb   :  { %1074 = vmatprep.mubr.msk.bf16.mxu0 %vm1227_vm0, %v1226_v2 }
   0xc   :  { %23 = vsyncpa [#allocation5], 0  ;;  %v69_v5 = vld [vmem:[%s1490_s3] sm:$0x3]  ;;  %vm138_vm2 = vcmask 1041408   ;;  %vm134_vm3 = vcmask 31744   ;;  %v60_v62 = vlaneseq }
   0xd   :  { %v140_v6 = vsel %vm138_vm2, %v69_v5, 0  ;;  %v1162_v12 = vld [vmem:[%s1492_s5] sm:$0xff]   ;;  %v1163_v13 = vld [vmem:[%s1492_s5 + $0x8] sm:$0xff]   ;;  %vm208_vm6 = vcmask 261120   ;;  %v1228_v26 = vmov 0.0|0.0   ;;  %vm359_vm8 = vcmask 254976  }
   0xe   :  { %1065 = vmatpush3.bf16.msra.mxu1 %v140_v6  ;;  %1071 = vmatpush3.bf16.msra.mxu0 %v1162_v12  ;;  %v999_v14 = vld [vmem:[%s1491_s4] ss:$0 sm:$0xff]  ;;  %v61_v63 = vshrl.u32 %v60_v62, 7  ;;  %vm584_vm11 = vcmask 523520   ;;  %vm661_vm12 = vcmask 517376   ;;  %vm886_vm15 = vcmask 785920  }
   0xf   :  { %1072 = vmatprep.subr.bf16.mxu0 %v1226_v2  ;;  %1143 = vmatprep.subr.bf16.mxu1 %v1228_v26  ;;  %v1001_v27 = vld [vmem:[%s1493_s6] ss:$0 sm:$0xff] }
  0x10   :  { %v995_v0 = vld [vmem:[%s1489_s2] ss:$0 sm:$0xff] }
  0x11   :  { %vm66_vm7 = vcmp.eq.s32.totalorder %v61_v63, %v995_v0 }
  0x12   :  { %1073 = vmatpush3.bf16.msra.mxu0 %v1163_v13 }
  0x13   :  { %1091 = vmatprep.subr.bf16.mxu0 %v1226_v2 }
  0xdd   :  { %v120_v7 = vpop.f32.mrb[0].mxu0 }
  0xde   :  { %v1062_v8 = vpop.f32.mrb[1].mxu0 }
  0xdf   :  { %v123_v9 = vpop.f32.mrb[2].mxu0  ;;  %v1164_v8 = vld [vmem:[%s1494_s7] sm:$0xff]  }
  0xe0   :  { %v127_v10 = vpack.c.bf16 %v123_v9, %v120_v7  ;;  %v1063_v11 = vpop.f32.mrb[3].mxu0  ;;  %v1375_v7 = vsel %vm66_vm7, 1.0, %v1226_v2  ;;  %v1165_v9 = vld [vmem:[%s1494_s7 + $0x8] sm:$0xff]  }
  0xe2   :  { %1067 = vmatmul.mubr.msk.bf16.vlgmr.msra.gmra.mrb[0].mxu1 %vm134_vm3, %v127_v10 }
  0xe3   :  { %1082 = vmatprep.mubr.msk.f32.mxu1 %vm1227_vm0, %v1226_v2 }
 0x1b5   :  { %v176_v15 = vpop.f32.mrb[0].mxu1 }
 0x1b6   :  { %v177_v16 = vadd.f32 %v999_v14, %v176_v15  ;;  %v1068_v17 = vpop.f32.mrb[1].mxu1 }
 0x1b7   :  { %v179_v18 = vpop.f32.mrb[2].mxu1  ;;  %v1166_v17 = vld [vmem:[%s1496_s9] sm:$0xff]  }
 0x1b8   :  { %v185_v19 = vmul.f32 0.01, %v177_v16  ;;  %v180_v20 = vadd.f32 %v999_v14, %v179_v18  ;;  %v1069_v21 = vpop.f32.mrb[3].mxu1  ;;  %vm183_vm4 = vcmp.gt.f32.partialorder %v177_v16, 0.0  ;;  %v1167_v18 = vld [vmem:[%s1496_s9 + $0x8] sm:$0xff]  }
 0x1ba   :  { %vm184_vm5 = vcmp.gt.f32.partialorder %v180_v20, 0.0  ;;  %v186_v22 = vmul.f32 0.01, %v180_v20  ;;  %v187_v23 = vsel %vm183_vm4, %v177_v16, %v185_v19  ;;  %v1007_v19 = vld [vmem:[%s1495_s8] ss:$0 sm:$0xff] }
 0x1bc   :  { %v188_v24 = vsel %vm184_vm5, %v180_v20, %v186_v22 }
 0x1bd   :  { %v189_v25 = vpack.c.bf16 %v188_v24, %v187_v23 }
 0x1bf   :  { %1075 = vmatmul.mubr.msk.bf16.vlgmr.msra.gmra.mrb[4].mxu0 %vm208_vm6, %v189_v25 }
 0x1c0   :  { %1095 = vmatprep.mubr.msk.bf16.mxu0 %vm1227_vm0, %v1226_v2  ;;  %1092 = vmatpush3.bf16.msra.mxu0 %v1164_v8 }
 0x1c1   :  { %1093 = vmatprep.subr.bf16.mxu0 %v1226_v2 }
 0x1c4   :  { %1094 = vmatpush3.bf16.msra.mxu0 %v1165_v9 }
 0x1c5   :  { %1146 = vmatprep.subr.bf16.mxu0 %v1228_v26 }
 0x292   :  { %v246_v28 = vpop.f32.mrb[4].mxu0 }
 0x293   :  { %v247_v29 = vadd.f32 %v1001_v27, %v246_v28  ;;  %v1076_v30 = vpop.f32.mrb[5].mxu0 }
 0x294   :  { %v249_v31 = vpop.f32.mrb[6].mxu0 }
 0x295   :  { %v262_v32 = vmul.f32 %v247_v29, %v247_v29  ;;  %v250_v33 = vadd.f32 %v1001_v27, %v249_v31  ;;  %v1077_v34 = vpop.f32.mrb[7].mxu0  ;;  %v253_v35 = vsel %vm208_vm6, %v247_v29, 0.0 }
 0x297   :  { %v254_v36 = vsel %vm208_vm6, %v250_v33, 0.0  ;;  %v263_v37 = vmul.f32 %v250_v33, %v250_v33  ;;  %v264_v39 = vsel %vm208_vm6, %v262_v32, 0.0  ;;  %v1011_v32 = vld [vmem:[%s1497_s10] ss:$0 sm:$0xff]  ;;  %s1229_s10 = smov 32  }
 0x298   :  { %v255_v38 = vadd.f32 %v254_v36, %v253_v35 }
 0x299   :  { %v265_v40 = vsel %vm208_vm6, %v263_v37, 0.0 }
 0x29a   :  { %v256_v41 = vrot.slane %v255_v38, 4  ;;  %v266_v42 = vadd.f32 %v265_v40, %v264_v39 }
 0x29c   :  { %v257_v43 = vadd.f32 %v256_v41, %v255_v38  ;;  %v267_v44 = vrot.slane %v266_v42, 4 }
 0x29e   :  { %v258_v45 = vrot.slane %v257_v43, 2  ;;  %v268_v46 = vadd.f32 %v267_v44, %v266_v42 }
 0x2a0   :  { %v259_v47 = vadd.f32 %v258_v45, %v257_v43  ;;  %v269_v48 = vrot.slane %v268_v46, 2 }
 0x2a2   :  { %v260_v49 = vrot.slane %v259_v47, 1  ;;  %v270_v50 = vadd.f32 %v269_v48, %v268_v46 }
 0x2a4   :  { %v261_v51 = vadd.f32 %v260_v49, %v259_v47  ;;  %v271_v52 = vrot.slane %v270_v50, 1 }
 0x2a6   :  { %v272_v53 = vadd.f32 %v271_v52, %v270_v50  ;;  %v273_v54 = vmul.f32 0.0625, %v261_v51 }
 0x2a8   :  { %v274_v55 = vmul.f32 0.0625, %v272_v53  ;;  %v275_v56 = vmul.f32 %v273_v54, %v273_v54  ;;  %v279_v57 = vsub.f32 %v250_v33, %v273_v54  ;;  %v278_v58 = vsub.f32 %v247_v29, %v273_v54 }
 0x2aa   :  { %v276_v59 = vsub.f32 %v274_v55, %v275_v56 }
 0x2ac   :  { %v277_v60 = vmax.f32 %v276_v59, 0.0 }
 0x2ae   :  { %v280_v61 = vadd.f32 0.0001, %v277_v60 }
 0x2b0   :  { %1172 = vrsqrt.f32 %v280_v61 }
 0x2ba   :  { %v1173_v1 = vpop.eup %1172 }
 0x2bb   :  { %v283_v3 = vmul.f32 %v1173_v1, %v279_v57  ;;  %v282_v5 = vmul.f32 %v1173_v1, %v278_v58 }
 0x2bd   :  { %285 = vst.msk [vmem:[#allocation2 + $0x8] sm:$0xff] %vm208_vm6, %v283_v3  ;;  %v1144_v6 = vpack.c.bf16 %v283_v3, %v282_v5  ;;  %284 = vst.msk [vmem:[#allocation2] sm:$0xff] %vm208_vm6, %v282_v5 }
 0x2bf   :  { %1145 = vmatpush3.bf16.msra.mxu1 %v1144_v6 }
 0x2c0   :  { %1085 = vmatprep.subr.bf16.mxu1 %v1226_v2 }
 0x2c2   :  { %1083 = vmatmul.mubr.msk.f32.vlgmr.msra.gmra.mrb[4].mxu1 %vm82_vm1, %v1375_v7 }
 0x2c3   :  { %1086 = vmatpush3.bf16.msra.mxu1 %v1144_v6  ;;  %1087 = vmatprep.mubr.msk.bf16.mxu1 %vm1227_vm0, %v1226_v2 }
 0x2c4   :  { %1099 = vmatprep.subr.bf16.mxu1 %v1226_v2 }
 0x2c6   :  { %1088 = vmatmul.mubr.msk.bf16.vlgmr.msra.gmra.mrb[8].mxu1 %vm82_vm1, %v1332_v4 }
 0x2c7   :  { %1103 = vmatprep.mubr.msk.bf16.mxu1 %vm1227_vm0, %v1226_v2  ;;  %1100 = vmatpush3.bf16.msra.mxu1 %v1166_v17 }
 0x2c8   :  { %1101 = vmatprep.subr.bf16.mxu1 %v1226_v2 }
 0x2cb   :  { %1102 = vmatpush3.bf16.msra.mxu1 %v1167_v18 }
 0x2cc   :  { %1120 = vmatprep.subr.bf16.mxu1 %v1226_v2 }
 0x395   :  { %v355_v10 = vpop.f32.mrb[4].mxu1 }
 0x396   :  { %360 = vst.msk [vmem:[#allocation4] sm:$0x3] %vm359_vm8, %v355_v10  ;;  %v1084_v11 = vpop.f32.mrb[5].mxu1  ;;  %v1168_v10 = vld [vmem:[%s1498_s11] sm:$0xff]  }
 0x397   :  { %v1169_v11 = vld [vmem:[%s1498_s11 + $0x8] sm:$0xff]  }
 0x399   :  { %v406_v12 = vpop.f32.mrb[8].mxu1 }
 0x39a   :  { %v1089_v13 = vpop.f32.mrb[9].mxu1 }
 0x39b   :  { %v409_v14 = vpop.f32.mrb[10].mxu1 }
 0x39c   :  { %v413_v15 = vpack.c.bf16 %v409_v14, %v406_v12  ;;  %v1090_v16 = vpop.f32.mrb[11].mxu1 }
 0x39e   :  { %1096 = vmatmul.mubr.msk.bf16.vlgmr.msra.gmra.mrb[8].mxu0 %vm208_vm6, %v413_v15 }
 0x39f   :  { %1111 = vmatprep.mubr.msk.f32.mxu0 %vm1227_vm0, %v1226_v2 }
 0x471   :  { %v469_v20 = vpop.f32.mrb[8].mxu0 }
 0x472   :  { %v470_v21 = vadd.f32 %v1007_v19, %v469_v20  ;;  %v1097_v22 = vpop.f32.mrb[9].mxu0  ;;  %v1171_v20 = vld [vmem:[%s1500_s13 + $0x8] sm:$0xff]  }
 0x473   :  { %v472_v23 = vpop.f32.mrb[10].mxu0  ;;  %v1017_v22 = vld [vmem:[%s1499_s12] ss:$0 sm:$0xff]  ;;  %s1230_s12 = smov 64  }
 0x474   :  { %v478_v24 = vmul.f32 0.01, %v470_v21  ;;  %v473_v25 = vadd.f32 %v1007_v19, %v472_v23  ;;  %v1098_v27 = vpop.f32.mrb[11].mxu0  ;;  %vm476_vm9 = vcmp.gt.f32.partialorder %v470_v21, 0.0 }
 0x476   :  { %vm477_vm10 = vcmp.gt.f32.partialorder %v473_v25, 0.0  ;;  %v479_v28 = vmul.f32 0.01, %v473_v25  ;;  %v480_v29 = vsel %vm476_vm9, %v470_v21, %v478_v24 }
 0x478   :  { %v481_v30 = vsel %vm477_vm10, %v473_v25, %v479_v28 }
 0x479   :  { %v482_v31 = vpack.c.bf16 %v481_v30, %v480_v29 }
 0x47b   :  { %1104 = vmatmul.mubr.msk.bf16.vlgmr.msra.gmra.mrb[12].mxu1 %vm208_vm6, %v482_v31 }
 0x47c   :  { %1124 = vmatprep.mubr.msk.bf16.mxu1 %vm1227_vm0, %v1226_v2  ;;  %1121 = vmatpush3.bf16.msra.mxu1 %v1168_v10 }
 0x47d   :  { %1122 = vmatprep.subr.bf16.mxu1 %v1226_v2 }
 0x480   :  { %1123 = vmatpush3.bf16.msra.mxu1 %v1169_v11 }
 0x481   :  { %1149 = vmatprep.subr.bf16.mxu1 %v1228_v26  ;;  %v1170_v26 = vld [vmem:[%s1500_s13] sm:$0xff]  }
 0x54e   :  { %v538_v33 = vpop.f32.mrb[12].mxu1 }
 0x54f   :  { %v539_v34 = vadd.f32 %v1011_v32, %v538_v33  ;;  %v1105_v35 = vpop.f32.mrb[13].mxu1 }
 0x550   :  { %v541_v36 = vpop.f32.mrb[14].mxu1 }
 0x551   :  { %v554_v37 = vmul.f32 %v539_v34, %v539_v34  ;;  %v542_v38 = vadd.f32 %v1011_v32, %v541_v36  ;;  %v1106_v39 = vpop.f32.mrb[15].mxu1  ;;  %v545_v40 = vsel %vm208_vm6, %v539_v34, 0.0 }
 0x553   :  { %v546_v41 = vsel %vm208_vm6, %v542_v38, 0.0  ;;  %v555_v42 = vmul.f32 %v542_v38, %v542_v38  ;;  %v556_v44 = vsel %vm208_vm6, %v554_v37, 0.0 }
 0x554   :  { %v547_v43 = vadd.f32 %v546_v41, %v545_v40 }
 0x555   :  { %v557_v45 = vsel %vm208_vm6, %v555_v42, 0.0 }
 0x556   :  { %v548_v46 = vrot.slane %v547_v43, 4  ;;  %v558_v47 = vadd.f32 %v557_v45, %v556_v44 }
 0x558   :  { %v549_v48 = vadd.f32 %v548_v46, %v547_v43  ;;  %v559_v49 = vrot.slane %v558_v47, 4 }
 0x55a   :  { %v550_v50 = vrot.slane %v549_v48, 2  ;;  %v560_v51 = vadd.f32 %v559_v49, %v558_v47 }
 0x55c   :  { %v551_v52 = vadd.f32 %v550_v50, %v549_v48  ;;  %v561_v53 = vrot.slane %v560_v51, 2 }
 0x55e   :  { %v552_v54 = vrot.slane %v551_v52, 1  ;;  %v562_v55 = vadd.f32 %v561_v53, %v560_v51 }
 0x560   :  { %v553_v56 = vadd.f32 %v552_v54, %v551_v52  ;;  %v563_v57 = vrot.slane %v562_v55, 1 }
 0x562   :  { %v564_v58 = vadd.f32 %v563_v57, %v562_v55  ;;  %v565_v59 = vmul.f32 0.0625, %v553_v56 }
 0x564   :  { %v566_v60 = vmul.f32 0.0625, %v564_v58  ;;  %v567_v61 = vmul.f32 %v565_v59, %v565_v59  ;;  %v571_v62 = vsub.f32 %v542_v38, %v565_v59  ;;  %v570_v63 = vsub.f32 %v539_v34, %v565_v59  ;;  %v1021_v34 = vld [vmem:[%s1501_s14] ss:$0 sm:$0xff]  ;;  %s1231_s14 = smov [#allocation2]  }
 0x565   :  { %s970_s6 = sshll.u32 %s1231_s14, 4  ;;  %s971_s6 = int_to_ptr.vmem [resolvable:$true] %s970_s6 }
 0x566   :  { %v568_v0 = vsub.f32 %v566_v60, %v567_v61  ;;  %s1178_s19 = scalar_lea.vmem %s971_s6, 256  ;;  %p1183_p1 = scmp.lt.s32.totalorder %s971_s6, %s971_s6 }
 0x567   :  { %p1179_p0 = scmp.ne.s32.totalorder %s971_s6, %s1178_s19  ;;  %p1184_p2 = scmp.lt.s32.totalorder %s1178_s19, %s1178_s19 }
 0x568   :  { %v569_v1 = vmax.f32 %v568_v0, 0.0 }
 0x569   :  { %p1185_p3 = por %p1184_p2, %p1183_p1 }
 0x56a   :  { %v572_v3 = vadd.f32 0.0001, %v569_v1 }
 0x56b   :  { %p1186_p4 = pnand %p1185_p3, %p1179_p0 }
 0x56c   :  { %1174 = vrsqrt.f32 %v572_v3 }
 0x576   :  { %v1175_v5 = vpop.eup %1174 }
 0x577   :  { %v574_v6 = vmul.f32 %v1175_v5, %v570_v63  ;;  %v575_v8 = vmul.f32 %v1175_v5, %v571_v62 }
 0x579   :  { %578 = vrot.lane.b32.xlu0 %v574_v6, %s1229_s10  ;;  %v1147_v9 = vpack.c.bf16 %v575_v8, %v574_v6 }
 0x57b   :  { %1148 = vmatpush3.bf16.msra.mxu0 %v1147_v9 }
 0x57c   :  { %1114 = vmatprep.subr.bf16.mxu0 %v1226_v2 }
 0x57d   :  { %580 = vrot.lane.b32.xlu0 %v575_v8, %s1229_s10 }
 0x57e   :  { %1112 = vmatmul.mubr.msk.f32.vlgmr.msra.gmra.mrb[12].mxu0 %vm82_vm1, %v1375_v7 }
 0x57f   :  { %1115 = vmatpush3.bf16.msra.mxu0 %v1147_v9  ;;  %1116 = vmatprep.mubr.msk.bf16.mxu0 %vm1227_vm0, %v1226_v2 }
 0x580   :  { %1128 = vmatprep.subr.bf16.mxu0 %v1226_v2 }
 0x582   :  { %1117 = vmatmul.mubr.msk.bf16.vlgmr.msra.gmra.mrb[16].mxu0 %vm82_vm1, %v1332_v4 }
 0x583   :  { %1132 = vmatprep.mubr.msk.bf16.mxu0 %vm1227_vm0, %v1226_v2  ;;  %1129 = vmatpush3.bf16.msra.mxu0 %v1170_v26 }
 0x584   :  { %1130 = vmatprep.subr.bf16.mxu0 %v1226_v2 }
 0x587   :  { %1131 = vmatpush3.bf16.msra.mxu0 %v1171_v20 }
 0x5eb   :  { %v579_v12 = vpop.permute.xlu0 %578 }
 0x5ec   :  { %585 = vst.msk [vmem:[#allocation2] sm:$0xff] %vm584_vm11, %v579_v12 }
 0x5ef   :  { %v581_v4 = vpop.permute.xlu0 %580 }
 0x5f0   :  { %586 = vst.msk [vmem:[#allocation2 + $0x8] sm:$0xff] %vm584_vm11, %v581_v4 }
 0x651   :  { %v653_v13 = vpop.f32.mrb[12].mxu0 }
 0x652   :  { %658 = vrot.lane.b32.xlu1 %v653_v13, %s1229_s10  ;;  %v1113_v14 = vpop.f32.mrb[13].mxu0 }
 0x655   :  { %v708_v15 = vpop.f32.mrb[16].mxu0 }
 0x656   :  { %v1118_v16 = vpop.f32.mrb[17].mxu0 }
 0x657   :  { %v711_v17 = vpop.f32.mrb[18].mxu0 }
 0x658   :  { %v715_v18 = vpack.c.bf16 %v711_v17, %v708_v15  ;;  %v1119_v19 = vpop.f32.mrb[19].mxu0 }
 0x65a   :  { %1125 = vmatmul.mubr.msk.bf16.vlgmr.msra.gmra.mrb[16].mxu1 %vm208_vm6, %v715_v18 }
 0x65b   :  { %1140 = vmatprep.mubr.msk.f32.mxu1 %vm1227_vm0, %v1226_v2 }
 0x6c4   :  { %v659_v21 = vpop.permute.xlu1 %658 }
 0x6c5   :  { %662 = vst.msk [vmem:[#allocation4] sm:$0x3] %vm661_vm12, %v659_v21 }
 0x72d   :  { %v771_v23 = vpop.f32.mrb[16].mxu1 }
 0x72e   :  { %v772_v24 = vadd.f32 %v1017_v22, %v771_v23  ;;  %v1126_v25 = vpop.f32.mrb[17].mxu1 }
 0x72f   :  { %v774_v27 = vpop.f32.mrb[18].mxu1 }
 0x730   :  { %v780_v28 = vmul.f32 0.01, %v772_v24  ;;  %v775_v29 = vadd.f32 %v1017_v22, %v774_v27  ;;  %v1127_v30 = vpop.f32.mrb[19].mxu1  ;;  %vm778_vm13 = vcmp.gt.f32.partialorder %v772_v24, 0.0 }
 0x732   :  { %vm779_vm14 = vcmp.gt.f32.partialorder %v775_v29, 0.0  ;;  %v781_v2 = vmul.f32 0.01, %v775_v29  ;;  %v782_v31 = vsel %vm778_vm13, %v772_v24, %v780_v28 }
 0x734   :  { %v783_v32 = vsel %vm779_vm14, %v775_v29, %v781_v2 }
 0x735   :  { %v784_v33 = vpack.c.bf16 %v783_v32, %v782_v31 }
 0x737   :  { %1133 = vmatmul.mubr.msk.bf16.vlgmr.msra.gmra.mrb[20].mxu0 %vm208_vm6, %v784_v33 }
 0x80a   :  { %v840_v35 = vpop.f32.mrb[20].mxu0 }
 0x80b   :  { %v841_v36 = vadd.f32 %v1021_v34, %v840_v35  ;;  %v1134_v37 = vpop.f32.mrb[21].mxu0 }
 0x80c   :  { %v843_v38 = vpop.f32.mrb[22].mxu0 }
 0x80d   :  { %v856_v39 = vmul.f32 %v841_v36, %v841_v36  ;;  %v844_v40 = vadd.f32 %v1021_v34, %v843_v38  ;;  %v1135_v41 = vpop.f32.mrb[23].mxu0  ;;  %v847_v42 = vsel %vm208_vm6, %v841_v36, 0.0 }
 0x80f   :  { %v848_v43 = vsel %vm208_vm6, %v844_v40, 0.0  ;;  %v857_v44 = vmul.f32 %v844_v40, %v844_v40  ;;  %v858_v46 = vsel %vm208_vm6, %v856_v39, 0.0 }
 0x810   :  { %v849_v45 = vadd.f32 %v848_v43, %v847_v42 }
 0x811   :  { %v859_v47 = vsel %vm208_vm6, %v857_v44, 0.0 }
 0x812   :  { %v850_v48 = vrot.slane %v849_v45, 4  ;;  %v860_v49 = vadd.f32 %v859_v47, %v858_v46 }
 0x814   :  { %v851_v50 = vadd.f32 %v850_v48, %v849_v45  ;;  %v861_v51 = vrot.slane %v860_v49, 4 }
 0x816   :  { %v852_v52 = vrot.slane %v851_v50, 2  ;;  %v862_v53 = vadd.f32 %v861_v51, %v860_v49 }
 0x818   :  { %v853_v54 = vadd.f32 %v852_v52, %v851_v50  ;;  %v863_v55 = vrot.slane %v862_v53, 2 }
 0x81a   :  { %v854_v56 = vrot.slane %v853_v54, 1  ;;  %v864_v57 = vadd.f32 %v863_v55, %v862_v53 }
 0x81c   :  { %v855_v58 = vadd.f32 %v854_v56, %v853_v54  ;;  %v865_v59 = vrot.slane %v864_v57, 1 }
 0x81e   :  { %v866_v60 = vadd.f32 %v865_v59, %v864_v57  ;;  %v867_v61 = vmul.f32 0.0625, %v855_v58 }
 0x820   :  { %v868_v62 = vmul.f32 0.0625, %v866_v60  ;;  %v869_v63 = vmul.f32 %v867_v61, %v867_v61  ;;  %v873_v0 = vsub.f32 %v844_v40, %v867_v61  ;;  %v872_v1 = vsub.f32 %v841_v36, %v867_v61 }
 0x822   :  { %v870_v3 = vsub.f32 %v868_v62, %v869_v63 }
 0x824   :  { %v871_v5 = vmax.f32 %v870_v3, 0.0 }
 0x826   :  { %v874_v6 = vadd.f32 0.0001, %v871_v5 }
 0x828   :  { %1176 = vrsqrt.f32 %v874_v6 }
 0x832   :  { %v1177_v8 = vpop.eup %1176 }
 0x833   :  { %v877_v9 = vmul.f32 %v1177_v8, %v873_v0  ;;  %v876_v10 = vmul.f32 %v1177_v8, %v872_v1 }
 0x835   :  { %882 = vrot.lane.b32.xlu0 %v877_v9, %s1230_s12  ;;  %880 = vrot.lane.b32.xlu1 %v876_v10, %s1230_s12  ;;  %v1150_v11 = vpack.c.bf16 %v877_v9, %v876_v10 }
 0x837   :  { %1151 = vmatpush3.bf16.msra.mxu1 %v1150_v11 }
 0x83a   :  { %1141 = vmatmul.mubr.msk.f32.vlgmr.msra.gmra.mrb[6].mxu1 %vm82_vm1, %v1375_v7 }
 0x8a7   :  { %v883_v12 = vpop.permute.xlu0 %882  ;;  %v881_v4 = vpop.permute.xlu1 %880 }
 0x8a8   :  { %888 = vst.msk [vmem:[#allocation2 + $0x8] sm:$0xff] %vm886_vm15, %v883_v12  ;;  %887 = vst.msk [vmem:[#allocation2] sm:$0xff] %vm886_vm15, %v881_v4 }
 0x8a9   :  { %1189 = shalt.err (!%p1186_p4)
}
 0x8aa   :  { %s1190_s21 = scalar_lea.hbm %s1502_s15, 256 }
 0x8ab   :  { %p1191_p5 = scmp.ne.s32.totalorder %s1502_s15, %s1190_s21  ;;  %p1194_p6 = scmp.lt.u32.totalorder %s1190_s21, %s1502_s15 }
 0x8ad   :  { %p1196_p7 = pnand %p1194_p6, %p1191_p5 }
 0x8af   :  { %1199 = shalt.err (!%p1196_p7)
}
 0x8b0   :  { %s1232_s25 = smov 128   ;;  %s1233_s26 = smov 8   ;;  %vm963_vm0 = vcmask 779776  }
 0x8b1   :  { %976 = dma.vmem_to_hbm [thread:$0]  %s971_s6, 256, %s1502_s15, [#allocation3], %s1232_s25, %s1232_s25, %s1233_s26  }
 0x8b2   :  { %s1234_s8 = smov [#allocation4]  }
 0x8b3   :  { %s983_s10 = sshll.u32 %s1234_s8, 4  ;;  %s984_s10 = int_to_ptr.vmem [resolvable:$true] %s983_s10 }
 0x8b4   :  { %s1200_s1 = scalar_lea.vmem %s984_s10, 32  ;;  %p1205_p9 = scmp.lt.s32.totalorder %s984_s10, %s984_s10 }
 0x8b5   :  { %p1201_p8 = scmp.ne.s32.totalorder %s984_s10, %s1200_s1  ;;  %p1206_p10 = scmp.lt.s32.totalorder %s1200_s1, %s1200_s1 }
 0x8b7   :  { %p1207_p11 = por %p1206_p10, %p1205_p9 }
 0x8b9   :  { %p1208_p12 = pnand %p1207_p11, %p1201_p8 }
 0x90d   :  { %v955_v7 = vpop.f32.mrb[6].mxu1 }
 0x90e   :  { %v1142_v13 = vpop.f32.mrb[7].mxu1  ;;  %960 = vrot.lane.b32.xlu1 %v955_v7, %s1230_s12 }
 0x980   :  { %v961_v14 = vpop.permute.xlu1 %960 }
 0x981   :  { %964 = vst.msk [vmem:[#allocation4] sm:$0x3] %vm963_vm0, %v961_v14 }
 0x982   :  { %1211 = shalt.err (!%p1208_p12)
}
 0x983   :  { %s1212_s15 = scalar_lea.hbm %s1503_s16, 32 }
 0x984   :  { %p1213_p13 = scmp.ne.s32.totalorder %s1503_s16, %s1212_s15  ;;  %p1216_p0 = scmp.lt.u32.totalorder %s1212_s15, %s1503_s16 }
 0x986   :  { %p1218_p1 = pnand %p1216_p0, %p1213_p13 }
 0x988   :  { %1221 = shalt.err (!%p1218_p1)
}
 0x989   :  { %986 = dma.vmem_to_hbm [thread:$0]  %s984_s10, 32, %s1503_s16, [#allocation5]  }
 0x98a   :  { %1222 = dma.done.wait [#allocation3], 256  }
 0x98b   :  { %1223 = vsyncadd [#allocation3], 4294967040 }
 0x98c   :  { %1224 = dma.done.wait [#allocation5], 32  }
 0x98d   :  { %1225 = vsyncadd [#allocation5], 4294967264 }
 0x98e   :  { %993 = vsyncpa [#allocation3], 1 }
 0x98f   :  { %994 = vsyncpa [#allocation5], 1 }

</bundles_post_ra>
